<compile_context>
chip_gen: v7x
topology: tpu7x:2x2x1
jax: 0.10.0
libtpu: 0.0.40
codegen_flags: <defaults>
</compile_context>

<pallas_src>
import functools

import jax
import jax.numpy as jnp
from jax.experimental import pallas as pl
from jax.experimental.pallas import tpu as pltpu


# Conservative: within v7x scoped default (32 MiB) and v5e/v6e physical VMEM.
_VMEM_LIMIT_BYTES = 32 * 1024 * 1024
# Per-input tile byte budget (covers the 2x double-buffering).
_TILE_BUDGET_BYTES = 4 * 1024 * 1024


def _choose_lane_tile(L, bytes_per_lane, budget=_TILE_BUDGET_BYTES):
    """Pick the largest lane tile that divides L (multiple of 128, or full L)
    such that 2 (double-buffer) * bytes_per_lane * TL stays within budget."""
    max_tl = (budget // (2 * max(1, bytes_per_lane))) // 128 * 128
    max_tl = max(128, max_tl)
    if L <= max_tl:
        return L
    t = max_tl
    while t >= 128:
        if L % t == 0:
            return t
        t -= 128
    return L  # fallback: single block (L has no 128-multiple divisor in budget)


# -----------------------------------------------------------------------------
# Kernel A: attn_proj (1x1 conv, 16 -> 1, + bias) followed by sigmoid.
# The two attention maps are passed separately (no wrapper concat); the 16-ch
# weighted sum is split into two 8-channel sums in-kernel.
#   a0_ref : (B, H0, TL)  VMEM   attns[-2] flattened, tile of L
#   a1_ref : (B, H1, TL)  VMEM   attns[-1] flattened, tile of L
#   w_ref  : (16, 1)      VMEM   conv weight (1, 16, 1, 1) reshaped
#   b_ref  : (1, 1)       SMEM   conv bias
#   o_ref  : (B, TL)      VMEM
# -----------------------------------------------------------------------------
def _attn_proj_kernel(a0_ref, a1_ref, w_ref, b_ref, out_ref, *, n0):
    x0 = a0_ref[...].astype(jnp.float32)          # (B, n0, TL)
    x1 = a1_ref[...].astype(jnp.float32)          # (B, 16-n0, TL)
    w = w_ref[...].astype(jnp.float32)            # (16, 1)
    s = (jnp.sum(x0 * w[None, :n0, :], axis=1) +
         jnp.sum(x1 * w[None, n0:, :], axis=1))   # (B, TL)
    out_ref[...] = jax.nn.sigmoid(s + b_ref[0, 0])


def attn_proj_sigmoid(attn_a, attn_b, w, b):
    """attn_a: (B, H0, L), attn_b: (B, H1, L) with H0 + H1 == 16."""
    B, h0, L = attn_a.shape
    _, h1, _ = attn_b.shape
    assert h0 + h1 == 16
    bytes_per_lane = (B * (h0 + h1) + B) * 4      # both inputs + output, f32
    TL = _choose_lane_tile(L, bytes_per_lane)
    kern = functools.partial(_attn_proj_kernel, n0=h0)
    return pl.pallas_call(
        kern,
        out_shape=jax.ShapeDtypeStruct((B, L), jnp.float32),
        grid=(L // TL,),
        in_specs=[
            pl.BlockSpec((B, h0, TL), lambda l: (0, 0, l)),
            pl.BlockSpec((B, h1, TL), lambda l: (0, 0, l)),
            pl.BlockSpec((16, 1), lambda l: (0, 0)),
            pl.BlockSpec(memory_space=pltpu.MemorySpace.SMEM),
        ],
        out_specs=pl.BlockSpec((B, TL), lambda l: (0, l)),
        compiler_params=pltpu.CompilerParams(
            dimension_semantics=("parallel",),
            vmem_limit_bytes=_VMEM_LIMIT_BYTES),
    )(attn_a, attn_b, w, b)


# -----------------------------------------------------------------------------
# Kernel B: global pooling (gap/gmp) over spatial + classifier 1x1 conv
# (no bias), reduced over L tiles with a (B, C4) f32 VMEM accumulator.
#   x4_ref  : (B, C4, TL)  VMEM   tile of the flattened last-stage feature
#   w_ref   : (NC, C4)     VMEM   classifier weight (NC, C4, 1, 1) reshaped
#   out_ref : (B, NC)      VMEM   written on the last L tile only
#   acc_ref : (B, C4)      VMEM   scratch accumulator (sum or running max)
# -----------------------------------------------------------------------------
def _cls_kernel(x4_ref, w_ref, out_ref, acc_ref, *, use_max, inv_l):
    x = x4_ref[...].astype(jnp.float32)           # (B, C4, TL)

    @pl.when(pl.program_id(0) == 0)
    def _():
        if use_max:
            acc_ref[...] = jnp.full_like(acc_ref, -jnp.inf)
        else:
            acc_ref[...] = jnp.zeros_like(acc_ref)

    if use_max:
        acc_ref[...] = jnp.maximum(acc_ref[...], jnp.max(x, axis=2))
    else:
        acc_ref[...] = acc_ref[...] + jnp.sum(x, axis=2)

    @pl.when(pl.program_id(0) == pl.num_programs(0) - 1)
    def _():
        pooled = acc_ref[...]
        if not use_max:
            pooled = pooled * inv_l
        out_ref[...] = jnp.dot(pooled, w_ref[...].astype(jnp.float32).T,
                               preferred_element_type=jnp.float32)


def classify(x4_flat, w_cls, pooling="gap"):
    B, C4, L4 = x4_flat.shape
    NC = w_cls.shape[0]
    bytes_per_lane = B * C4 * 4
    TL = _choose_lane_tile(L4, bytes_per_lane)
    kern = functools.partial(_cls_kernel, use_max=(pooling == "gmp"),
                             inv_l=1.0 / float(L4))
    return pl.pallas_call(
        kern,
        out_shape=jax.ShapeDtypeStruct((B, NC), jnp.float32),
        grid=(L4 // TL,),
        in_specs=[
            pl.BlockSpec((B, C4, TL), lambda l: (0, 0, l)),
            pl.BlockSpec((NC, C4), lambda l: (0, 0)),
        ],
        out_specs=pl.BlockSpec((B, NC), lambda l: (0, 0)),
        scratch_shapes=[pltpu.VMEM((B, C4), jnp.float32)],
        compiler_params=pltpu.CompilerParams(
            dimension_semantics=("arbitrary",),   # reduction over L tiles
            vmem_limit_bytes=_VMEM_LIMIT_BYTES),
    )(x4_flat, w_cls)


# -----------------------------------------------------------------------------
# Kernel C (cam_only branch): cam_s4 = conv2d(_x4, classifier.weight).
# Per (batch, L-tile) 1x1 conv as a matmul: (NC, C4) @ (C4, TL) -> (NC, TL).
# Weight stays resident (constant index_map); both grid axes "parallel".
# -----------------------------------------------------------------------------
def _cam_kernel(x4_ref, w_ref, out_ref):
    out_ref[...] = jnp.dot(w_ref[...].astype(jnp.float32),
                           x4_ref[...].astype(jnp.float32),
                           preferred_element_type=jnp.float32)


def cam_conv(x4_flat, w_cls):
    B, C4, L4 = x4_flat.shape
    NC = w_cls.shape[0]
    bytes_per_lane = (C4 + NC) * 4                # input tile + output tile
    TL = _choose_lane_tile(L4, bytes_per_lane)
    return pl.pallas_call(
        _cam_kernel,
        out_shape=jax.ShapeDtypeStruct((B, NC, L4), jnp.float32),
        grid=(B, L4 // TL),
        in_specs=[
            pl.BlockSpec((pl.Squeezed(), C4, TL), lambda b, l: (b, 0, l)),
            pl.BlockSpec((NC, C4), lambda b, l: (0, 0)),
        ],
        out_specs=pl.BlockSpec((pl.Squeezed(), NC, TL), lambda b, l: (b, 0, l)),
        compiler_params=pltpu.CompilerParams(
            dimension_semantics=("parallel", "parallel"),
            vmem_limit_bytes=_VMEM_LIMIT_BYTES),
    )(x4_flat, w_cls)


# -----------------------------------------------------------------------------
# TSCD forward (post-encoder portion).
# -----------------------------------------------------------------------------
def tscd_forward(x4, attns, params, *, cam_only=False, pooling="gap"):
    """x4: (B, C4, H, W) NCHW last-stage feature.
    attns: list of attention maps, each (B, heads, N, N); last two are used."""
    B, C4, H, W = x4.shape
    attn_a, attn_b = attns[-2], attns[-1]         # no concat: fed separately
    _, h0, N, _ = attn_a.shape
    h1 = attn_b.shape[1]
    assert h0 + h1 == 16
    L = N * N

    attn_pred_flat = attn_proj_sigmoid(
        attn_a.reshape(B, h0, L), attn_b.reshape(B, h1, L),
        params["attn_proj_w"], params["attn_proj_b"])
    attn_pred = attn_pred_flat.reshape(B, N, N)   # == sigmoid(conv(cat))[:, 0]

    x4_flat = x4.reshape(B, C4, H * W)

    if cam_only:
        cam = cam_conv(x4_flat, params["classifier_w"])
        cam_s4 = jax.lax.stop_gradient(cam).reshape(B, -1, H, W)
        return cam_s4, attn_pred

    cls_x4 = classify(x4_flat, params["classifier_w"], pooling=pooling)
    cls_x4 = cls_x4.reshape(-1, params["classifier_w"].shape[0])

    seg = None  # TODO(synk): SegFormerHead decoder not defined in provided module.
    return cls_x4, seg, attns, attn_pred


# -----------------------------------------------------------------------------
# Deterministic parameter init (synthetic; matches shapes from __init__).
# -----------------------------------------------------------------------------
def init_params(key, c4, num_classes):
    k1, k2, k3 = jax.random.split(key, 3)
    # attn_proj: Conv2d(16, 1, 1, bias=True), kaiming_normal_(a=sqrt(5), fan_out)
    fan_out = 1
    gain = jnp.sqrt(2.0 / (1.0 + 5.0))
    std = gain / jnp.sqrt(float(fan_out))
    attn_proj_w = jax.random.normal(k1, (16, 1), jnp.float32) * std
    bound = 1.0 / jnp.sqrt(16.0)
    attn_proj_b = jax.random.uniform(k2, (1, 1), jnp.float32, -bound, bound)
    # classifier: Conv2d(c4, num_classes-1, 1, bias=False)
    classifier_w = jax.random.normal(
        k3, (num_classes - 1, c4), jnp.float32) * (1.0 / jnp.sqrt(float(c4)))
    return {
        "attn_proj_w": attn_proj_w,     # (16, 1)   <- (1, 16, 1, 1)
        "attn_proj_b": attn_proj_b,     # (1, 1)
        "classifier_w": classifier_w,   # (nc-1, c4) <- (nc-1, c4, 1, 1)
    }


if __name__ == "__main__":
    key = jax.random.PRNGKey(0)
    kx, ka1, ka2, kp = jax.random.split(key, 4)

    B, C4, H, W = 2, 32, 8, 8          # small stand-in for last-stage feature
    heads, N = 8, 16                   # last two attention maps: (B, 8, N, N)
    num_classes = 21

    x4 = jax.random.normal(kx, (B, C4, H, W), jnp.float32)
    attn3 = jax.random.normal(ka1, (B, heads, N, N), jnp.float32)
    attn4 = jax.random.normal(ka2, (B, heads, N, N), jnp.float32)
    attns = [attn3, attn4]

    params = init_params(kp, C4, num_classes)

    # default path: (cls_x4, seg, _attns, attn_pred)
    cls_x4, seg, _attns, attn_pred = tscd_forward(
        x4, attns, params, cam_only=False, pooling="gap")
    # cam_only path: (cam_s4, attn_pred)
    cam_s4, attn_pred2 = tscd_forward(x4, attns, params, cam_only=True)

    jax.block_until_ready((cls_x4, attn_pred, cam_s4, attn_pred2))

    # shape checks
    assert cls_x4.shape == (B, num_classes - 1)
    assert attn_pred.shape == (B, N, N)
    assert cam_s4.shape == (B, num_classes - 1, H, W)

    # numerical checks against plain-JAX references of the PyTorch ops
    attn_cat = jnp.concatenate(attns, axis=1)                     # (B, 16, N, N)
    ref_attn = jax.nn.sigmoid(
        jnp.einsum("bchw,c->bhw", attn_cat, params["attn_proj_w"][:, 0])
        + params["attn_proj_b"][0, 0])
    ref_cls = jnp.mean(x4, axis=(2, 3)) @ params["classifier_w"].T
    ref_cam = jnp.einsum("nc,bchw->bnhw", params["classifier_w"], x4)
    assert jnp.allclose(attn_pred, ref_attn, atol=1e-5, rtol=1e-5)
    assert jnp.allclose(cls_x4, ref_cls, atol=1e-5, rtol=1e-5)
    assert jnp.allclose(cam_s4, ref_cam, atol=1e-4, rtol=1e-5)

    print("KERNEL_OK")
</pallas_src>

<mosaic_0001>
module attributes {stable_mosaic.version = 11 : i64} {
  func.func @_attn_proj_kernel(%arg0: i32, %arg1: memref<2x8x256xf32, #tpu.memory_space<vmem>>, %arg2: memref<2x8x256xf32, #tpu.memory_space<vmem>>, %arg3: memref<16x1xf32, #tpu.memory_space<vmem>>, %arg4: memref<1x1xf32, #tpu.memory_space<smem>>, %arg5: memref<2x256xf32, #tpu.memory_space<vmem>>) attributes {dimension_semantics = [#tpu.dimension_semantics<parallel>], iteration_bounds = array<i64: 1>, scalar_prefetch = 0 : i64, scratch_operands = 0 : i64, tpu.core_type = #tpu.core_type<tc>, window_params = [{transform_indices = @transform_0, window_bounds = array<i64: 2, 8, 256>}, {transform_indices = @transform_1, window_bounds = array<i64: 2, 8, 256>}, {pipeline_mode = #tpu.pipeline_mode<synchronous>, transform_indices = @transform_2, window_bounds = array<i64: 16, 1>}, {transform_indices = @transform_3, window_bounds = array<i64: 1, 1>}, {transform_indices = @transform_4, window_bounds = array<i64: 2, 256>}]} {
    %c0 = arith.constant 0 : index
    %c0_0 = arith.constant 0 : index
    %c0_1 = arith.constant 0 : index
    %0 = vector.load %arg1[%c0, %c0_0, %c0_1] : memref<2x8x256xf32, #tpu.memory_space<vmem>>, vector<2x8x256xf32>
    %c0_2 = arith.constant 0 : index
    %c0_3 = arith.constant 0 : index
    %c0_4 = arith.constant 0 : index
    %1 = vector.load %arg2[%c0_2, %c0_3, %c0_4] : memref<2x8x256xf32, #tpu.memory_space<vmem>>, vector<2x8x256xf32>
    %c0_5 = arith.constant 0 : index
    %c0_6 = arith.constant 0 : index
    %2 = vector.load %arg3[%c0_5, %c0_6] : memref<16x1xf32, #tpu.memory_space<vmem>>, vector<16x1xf32>
    %3 = vector.extract_strided_slice %2 {offsets = [0, 0], sizes = [8, 1], strides = [1, 1]} : vector<16x1xf32> to vector<8x1xf32>
    %4 = vector.shape_cast %3 : vector<8x1xf32> to vector<1x8x1xf32>
    %5 = vector.broadcast %4 : vector<1x8x1xf32> to vector<2x8x256xf32>
    %6 = arith.mulf %0, %5 : vector<2x8x256xf32>
    %cst = arith.constant dense<0.000000e+00> : vector<2x256xf32>
    %7 = vector.multi_reduction <add>, %6, %cst [1] : vector<2x8x256xf32> to vector<2x256xf32>
    %8 = vector.extract_strided_slice %2 {offsets = [8, 0], sizes = [8, 1], strides = [1, 1]} : vector<16x1xf32> to vector<8x1xf32>
    %9 = vector.shape_cast %8 : vector<8x1xf32> to vector<1x8x1xf32>
    %10 = vector.broadcast %9 : vector<1x8x1xf32> to vector<2x8x256xf32>
    %11 = arith.mulf %1, %10 : vector<2x8x256xf32>
    %cst_7 = arith.constant dense<0.000000e+00> : vector<2x256xf32>
    %12 = vector.multi_reduction <add>, %11, %cst_7 [1] : vector<2x8x256xf32> to vector<2x256xf32>
    %13 = arith.addf %7, %12 : vector<2x256xf32>
    %c0_8 = arith.constant 0 : index
    %c0_9 = arith.constant 0 : index
    %14 = memref.load %arg4[%c0_8, %c0_9] : memref<1x1xf32, #tpu.memory_space<smem>>
    %15 = vector.broadcast %14 : f32 to vector<2x256xf32>
    %16 = arith.addf %13, %15 : vector<2x256xf32>
    %17 = arith.negf %16 : vector<2x256xf32>
    %18 = math.exp %17 : vector<2x256xf32>
    %cst_10 = arith.constant 1.000000e+00 : f32
    %19 = vector.broadcast %cst_10 : f32 to vector<2x256xf32>
    %20 = arith.addf %19, %18 : vector<2x256xf32>
    %21 = arith.divf %19, %20 : vector<2x256xf32>
    %c0_11 = arith.constant 0 : index
    %c0_12 = arith.constant 0 : index
    %22 = vector.load %arg5[%c0_11, %c0_12] : memref<2x256xf32, #tpu.memory_space<vmem>>, vector<2x256xf32>
    tpu.vector_store %arg5[%c0_11, %c0_12], %21 {strides = array<i32>} : memref<2x256xf32, #tpu.memory_space<vmem>>, vector<2x256xf32>,
    return
  }
  func.func @transform_0(%arg0: i32) -> (i32, i32, i32) {
    %c0_i32 = arith.constant 0 : i32
    %c0_i32_0 = arith.constant 0 : i32
    %c0_i32_1 = arith.constant 0 : i32
    return %c0_i32, %c0_i32_0, %arg0 : i32, i32, i32
  }
  func.func @transform_1(%arg0: i32) -> (i32, i32, i32) {
    %c0_i32 = arith.constant 0 : i32
    %c0_i32_0 = arith.constant 0 : i32
    %c0_i32_1 = arith.constant 0 : i32
    return %c0_i32, %c0_i32_0, %arg0 : i32, i32, i32
  }
  func.func @transform_2(%arg0: i32) -> (i32, i32) {
    %c0_i32 = arith.constant 0 : i32
    %c0_i32_0 = arith.constant 0 : i32
    %c0_i32_1 = arith.constant 0 : i32
    return %c0_i32, %c0_i32_0 : i32, i32
  }
  func.func @transform_3(%arg0: i32) -> (i32, i32) {
    %c0_i32 = arith.constant 0 : i32
    %c0_i32_0 = arith.constant 0 : i32
    %c0_i32_1 = arith.constant 0 : i32
    return %c0_i32, %c0_i32_0 : i32, i32
  }
  func.func @transform_4(%arg0: i32) -> (i32, i32) {
    %c0_i32 = arith.constant 0 : i32
    %c0_i32_0 = arith.constant 0 : i32
    return %c0_i32, %arg0 : i32, i32
  }
}

</mosaic_0001>

<bundles_post_ra>
// kernel: tpu_custom_call.1
= control target key start
LH: loop header
LB: loop body
LE: loop exit
PB: predicated region body
PF: predicated region fallthrough
CT: control target
= control target key end

     0   :  { %10 = vsyncpa [#allocation4], 0  ;;  %s385_s0 = inlined_call_operand.hbm [shape: f32[2,8,256], index: 0, kind: input, shape index: {}]   ;;  %s386_s1 = inlined_call_operand.hbm [shape: f32[2,8,256], index: 1, kind: input, shape index: {}]   ;;  %s387_s2 = inlined_call_operand.vmem [shape: f32[16,1], index: 2, kind: input, shape index: {}]   ;;  %s388_s3 = inlined_call_operand.<no memory space> [shape: f32[1,1], index: 3, kind: input, shape index: {}]   ;;  %s389_s4 = inlined_call_operand.hbm [shape: f32[2,256], index: 4, kind: output, shape index: {}]  }
   0x1   :  { %11 = vsyncpa [#allocation7], 0 }
   0x2   :  { %12 = vsyncpa [#allocation5], 0  ;;  %s308_s15 = smov [#allocation3]   ;;  %s236_s19 = scalar_lea.hbm %s385_s0, 512 }
   0x3   :  { %s18_s16 = sshll.u32 %s308_s15, 4  ;;  %p237_p0 = scmp.ne.s32.totalorder %s385_s0, %s236_s19  ;;  %s19_s16 = int_to_ptr.vmem [resolvable:$true] %s18_s16 }
   0x4   :  { %p240_p1 = scmp.lt.u32.totalorder %s236_s19, %s385_s0 }
   0x6   :  { %p242_p2 = pnand %p240_p1, %p237_p0 }
   0x8   :  { %245 = shalt.err (!%p242_p2)
}
   0x9   :  { %s246_s24 = scalar_lea.vmem %s19_s16, 512  ;;  %p251_p4 = scmp.lt.s32.totalorder %s19_s16, %s19_s16 }
   0xa   :  { %p247_p3 = scmp.ne.s32.totalorder %s19_s16, %s246_s24  ;;  %p252_p5 = scmp.lt.s32.totalorder %s246_s24, %s246_s24 }
   0xc   :  { %p253_p6 = por %p252_p5, %p251_p4 }
   0xe   :  { %p254_p7 = pnand %p253_p6, %p247_p3 }
  0x10   :  { %257 = shalt.err (!%p254_p7)
}
  0x11   :  { %s309_s25 = smov 256   ;;  %s310_s26 = smov 16  }
  0x12   :  { %24 = dma.hbm_to_vmem [thread:$0]  %s385_s0, 512, %s19_s16, [#allocation4], %s309_s25, %s309_s25, %s310_s26  }
  0x13   :  { %s311_s29 = smov [#allocation6]   ;;  %s258_s7 = scalar_lea.hbm %s386_s1, 512 }
  0x14   :  { %s30_s30 = sshll.u32 %s311_s29, 4  ;;  %p259_p8 = scmp.ne.s32.totalorder %s386_s1, %s258_s7  ;;  %s31_s30 = int_to_ptr.vmem [resolvable:$true] %s30_s30 }
  0x15   :  { %p262_p9 = scmp.lt.u32.totalorder %s258_s7, %s386_s1 }
  0x17   :  { %p264_p10 = pnand %p262_p9, %p259_p8 }
  0x19   :  { %267 = shalt.err (!%p264_p10)
}
  0x1a   :  { %s268_s12 = scalar_lea.vmem %s31_s30, 512  ;;  %p273_p12 = scmp.lt.s32.totalorder %s31_s30, %s31_s30 }
  0x1b   :  { %p269_p11 = scmp.ne.s32.totalorder %s31_s30, %s268_s12  ;;  %p274_p13 = scmp.lt.s32.totalorder %s268_s12, %s268_s12 }
  0x1d   :  { %p275_p0 = por %p274_p13, %p273_p12 }
  0x1f   :  { %p276_p1 = pnand %p275_p0, %p269_p11 }
  0x21   :  { %279 = shalt.err (!%p276_p1)
}
  0x22   :  { %36 = dma.hbm_to_vmem [thread:$0]  %s386_s1, 512, %s31_s30, [#allocation7], %s309_s25, %s309_s25, %s310_s26  }
  0x23   :  { %302 = dma.done.wait [#allocation4], 512  }
  0x24   :  { %303 = vsyncadd [#allocation4], 4294966784 }
  0x25   :  { %304 = dma.done.wait [#allocation7], 512  }
  0x26   :  { %305 = vsyncadd [#allocation7], 4294966784  ;;  %v312_v0 = vmov 0   ;;  %v55_v1 = vld [vmem:[%s387_s2] sm:$0xff]  ;;  %v56_v2 = vld [vmem:[%s387_s2 + $0x8] sm:$0xff]  ;;  %vm182_vm0 = vcmask 1041409  }
  0x27   :  { %219 = vset.pattern.permute.xlu0 %v312_v0  ;;  %v47_v3 = vld [vmem:[#allocation3] sm:$0xff]  ;;  %v48_v4 = vld [vmem:[#allocation3 + $0x8] sm:$0xff]  ;;  %v49_v5 = vld [vmem:[#allocation3 + $0x10] sm:$0xff]  ;;  %vm184_vm1 = vcmask 1043459   ;;  %vm186_vm2 = vcmask 1045509   ;;  %vm188_vm3 = vcmask 1047559  }
  0x28   :  { %59 = vperm.xlu0 %219, %v55_v1   ;;  %v50_v6 = vld [vmem:[#allocation3 + $0x18] sm:$0xff]  ;;  %v51_v12 = vld [vmem:[#allocation6] sm:$0xff]  ;;  %v52_v13 = vld [vmem:[#allocation6 + $0x8] sm:$0xff] }
  0x29   :  { %v53_v18 = vld [vmem:[#allocation6 + $0x10] sm:$0xff]  ;;  %v54_v19 = vld [vmem:[#allocation6 + $0x18] sm:$0xff] }
  0x2c   :  { %92 = vperm.xlu0 %219, %v56_v2  }
  0xa7   :  { %v60_v7 = vpop.permute.xlu0 %59 }
  0xa8   :  { %v62_v8 = vmul.f32 %v60_v7, %v47_v3  ;;  %v63_v9 = vmul.f32 %v60_v7, %v48_v4  ;;  %v64_v10 = vmul.f32 %v60_v7, %v49_v5  ;;  %v65_v11 = vmul.f32 %v60_v7, %v50_v6 }
  0xa9   :  { %v128_v5 = vstv %s388_s3  ;;  %s314_s3 = smov [#allocation8]  }
  0xaa   :  { %v66_v14 = vrot.slane %v62_v8, 4  ;;  %v72_v15 = vrot.slane %v63_v9, 4  ;;  %v78_v16 = vrot.slane %v64_v10, 4  ;;  %v84_v17 = vrot.slane %v65_v11, 4  ;;  %s198_s18 = sshll.u32 %s314_s3, 4  ;;  %s199_s18 = int_to_ptr.vmem [resolvable:$true] %s198_s18 }
  0xab   :  { %v93_v20 = vpop.permute.xlu0 %92  ;;  %s280_s19 = scalar_lea.vmem %s199_s18, 64  ;;  %p285_p3 = scmp.lt.s32.totalorder %s199_s18, %s199_s18 }
  0xac   :  { %v67_v21 = vadd.f32 %v66_v14, %v62_v8  ;;  %v73_v22 = vadd.f32 %v72_v15, %v63_v9  ;;  %v79_v23 = vadd.f32 %v78_v16, %v64_v10  ;;  %v85_v24 = vadd.f32 %v84_v17, %v65_v11  ;;  %p281_p2 = scmp.ne.s32.totalorder %s199_s18, %s280_s19  ;;  %p286_p4 = scmp.lt.s32.totalorder %s280_s19, %s280_s19 }
  0xad   :  { %v95_v25 = vmul.f32 %v93_v20, %v51_v12  ;;  %v96_v26 = vmul.f32 %v93_v20, %v52_v13  ;;  %v97_v27 = vmul.f32 %v93_v20, %v53_v18  ;;  %v98_v28 = vmul.f32 %v93_v20, %v54_v19 }
  0xae   :  { %v68_v29 = vrot.slane %v67_v21, 2  ;;  %v74_v30 = vrot.slane %v73_v22, 2  ;;  %v80_v31 = vrot.slane %v79_v23, 2  ;;  %v86_v32 = vrot.slane %v85_v24, 2  ;;  %p287_p5 = por %p286_p4, %p285_p3 }
  0xaf   :  { %v99_v33 = vrot.slane %v95_v25, 4  ;;  %v105_v34 = vrot.slane %v96_v26, 4  ;;  %v111_v35 = vrot.slane %v97_v27, 4  ;;  %v117_v36 = vrot.slane %v98_v28, 4 }
  0xb0   :  { %v69_v37 = vadd.f32 %v68_v29, %v67_v21  ;;  %v75_v38 = vadd.f32 %v74_v30, %v73_v22  ;;  %v81_v39 = vadd.f32 %v80_v31, %v79_v23  ;;  %v87_v40 = vadd.f32 %v86_v32, %v85_v24  ;;  %p288_p6 = pnand %p287_p5, %p281_p2 }
  0xb1   :  { %v100_v41 = vadd.f32 %v99_v33, %v95_v25  ;;  %v106_v42 = vadd.f32 %v105_v34, %v96_v26  ;;  %v112_v43 = vadd.f32 %v111_v35, %v97_v27  ;;  %v118_v44 = vadd.f32 %v117_v36, %v98_v28 }
  0xb2   :  { %v70_v49 = vrot.slane %v69_v37, 1  ;;  %v76_v50 = vrot.slane %v75_v38, 1  ;;  %v82_v51 = vrot.slane %v81_v39, 1  ;;  %v88_v52 = vrot.slane %v87_v40, 1 }
  0xb3   :  { %v101_v45 = vrot.slane %v100_v41, 2  ;;  %v107_v46 = vrot.slane %v106_v42, 2  ;;  %v113_v47 = vrot.slane %v112_v43, 2  ;;  %v119_v48 = vrot.slane %v118_v44, 2 }
  0xb4   :  { %v71_v61 = vadd.f32 %v70_v49, %v69_v37  ;;  %v77_v62 = vadd.f32 %v76_v50, %v75_v38  ;;  %v83_v63 = vadd.f32 %v82_v51, %v81_v39  ;;  %v89_v0 = vadd.f32 %v88_v52, %v87_v40 }
  0xb5   :  { %v102_v53 = vadd.f32 %v101_v45, %v100_v41  ;;  %v108_v54 = vadd.f32 %v107_v46, %v106_v42  ;;  %v114_v55 = vadd.f32 %v113_v47, %v112_v43  ;;  %v120_v56 = vadd.f32 %v119_v48, %v118_v44 }
  0xb6   :  { %v313_v26 = vmov 1983009808   ;;  %v165_v28 = vlaneseq }
  0xb7   :  { %v103_v57 = vrot.slane %v102_v53, 1  ;;  %v109_v58 = vrot.slane %v108_v54, 1  ;;  %v115_v59 = vrot.slane %v114_v55, 1  ;;  %v121_v60 = vrot.slane %v120_v56, 1 }
  0xb8   :  { %v163_v27 = vunpack.c.l.s4 %v313_v26  ;;  %v166_v30 = vshrl.u32 %v165_v28, 7 }
  0xb9   :  { %v104_v1 = vadd.f32 %v103_v57, %v102_v53  ;;  %v110_v2 = vadd.f32 %v109_v58, %v108_v54  ;;  %v116_v3 = vadd.f32 %v115_v59, %v114_v55  ;;  %v122_v4 = vadd.f32 %v121_v60, %v120_v56 }
  0xba   :  { %v164_v29 = vunpack.c.0.s8 %v163_v27 }
  0xbb   :  { %v123_v6 = vadd.f32 %v104_v1, %v71_v61  ;;  %v124_v7 = vadd.f32 %v110_v2, %v77_v62  ;;  %v125_v8 = vadd.f32 %v116_v3, %v83_v63  ;;  %v126_v9 = vadd.f32 %v122_v4, %v89_v0 }
  0xbc   :  { %v167_v34 = vsub.s32 %v164_v29, %v166_v30 }
  0xbd   :  { %v129_v10 = vadd.f32 %v128_v5, %v123_v6  ;;  %v130_v11 = vadd.f32 %v128_v5, %v124_v7  ;;  %v131_v12 = vadd.f32 %v128_v5, %v125_v8  ;;  %v132_v13 = vadd.f32 %v128_v5, %v126_v9 }
  0xbf   :  { %v208_v14 = vmul.f32 -1.442695, %v129_v10  ;;  %v209_v15 = vmul.f32 -1.442695, %v130_v11  ;;  %v210_v16 = vmul.f32 -1.442695, %v131_v12 }
  0xc0   :  { %v211_v17 = vmul.f32 -1.442695, %v132_v13 }
  0xc1   :  { %220 = vpow2.f32 %v208_v14 }
  0xc2   :  { %222 = vpow2.f32 %v209_v15 }
  0xc3   :  { %224 = vpow2.f32 %v210_v16 }
  0xc4   :  { %226 = vpow2.f32 %v211_v17 }
  0xcb   :  { %v221_v18 = vpop.eup %220 }
  0xcc   :  { %v223_v19 = vpop.eup %222  ;;  %v145_v20 = vadd.f32 1.0, %v221_v18 }
  0xcd   :  { %v225_v21 = vpop.eup %224  ;;  %v146_v22 = vadd.f32 1.0, %v223_v19 }
  0xce   :  { %v227_v23 = vpop.eup %226  ;;  %v147_v24 = vadd.f32 1.0, %v225_v21  ;;  %228 = vrcp.f32 %v145_v20 }
  0xcf   :  { %v148_v25 = vadd.f32 1.0, %v227_v23  ;;  %230 = vrcp.f32 %v146_v22 }
  0xd0   :  { %232 = vrcp.f32 %v147_v24 }
  0xd1   :  { %234 = vrcp.f32 %v148_v25 }
  0xd8   :  { %v229_v31 = vpop.eup %228 }
  0xd9   :  { %v231_v32 = vpop.eup %230 }
  0xda   :  { %v233_v33 = vpop.eup %232  ;;  %v161_v36 = vcombine.low %v229_v31, %v231_v32 }
  0xdb   :  { %v235_v35 = vpop.eup %234 }
  0xdc   :  { %v169_v37 = vcombine.low %v233_v33, %v235_v35  ;;  %v168_v39 = vrot.slane %v161_v36, %v167_v34 }
  0xde   :  { %v176_v38 = vrot.slane %v169_v37, %v167_v34 }
  0xe0   :  { %v181_v40 = vrot.slane %v176_v38, 7 }
  0xe2   :  { %v183_v41 = vsel %vm182_vm0, %v181_v40, %v168_v39 }
  0xe3   :  { %v185_v42 = vsel %vm184_vm1, %v181_v40, %v183_v41 }
  0xe4   :  { %v187_v43 = vsel %vm186_vm2, %v181_v40, %v185_v42 }
  0xe5   :  { %v189_v44 = vsel %vm188_vm3, %v181_v40, %v187_v43 }
  0xe6   :  { %191 = vst [vmem:[#allocation8] sm:$0xf] %v189_v44 }
  0xe7   :  { %291 = shalt.err (!%p288_p6)
}
  0xe8   :  { %s292_s22 = scalar_lea.hbm %s389_s4, 64 }
  0xe9   :  { %p293_p7 = scmp.ne.s32.totalorder %s389_s4, %s292_s22  ;;  %p296_p8 = scmp.lt.u32.totalorder %s292_s22, %s389_s4 }
  0xeb   :  { %p298_p9 = pnand %p296_p8, %p293_p7 }
  0xed   :  { %301 = shalt.err (!%p298_p9)
}
  0xee   :  { %201 = dma.vmem_to_hbm [thread:$0]  %s199_s18, 64, %s389_s4, [#allocation5]  }
  0xef   :  { %306 = dma.done.wait [#allocation5], 64  }
  0xf0   :  { %307 = vsyncadd [#allocation5], 4294967232 }
  0xf1   :  { %205 = vsyncpa [#allocation4], 1 }
  0xf2   :  { %206 = vsyncpa [#allocation7], 1 }
  0xf3   :  { %207 = vsyncpa [#allocation5], 1 }

</bundles_post_ra>
